<compile_context>
chip_gen: v7x
topology: tpu7x:2x2x1
jax: 0.10.0
libtpu: 0.0.40
codegen_flags: <defaults>
</compile_context>

<pallas_src>
import jax
import jax.numpy as jnp
from jax.experimental import pallas as pl
from jax.experimental.pallas import tpu as pltpu


# ~3 MiB per tile: with one input + one output tile, each double-buffered by
# the Pallas pipeline, peak VMEM is ~12-13 MiB -> fits v5e/v6e/v7x scoped
# defaults with headroom.
_TARGET_TILE_BYTES = 3 * 1024 * 1024


def _affine_kernel(a_ref, b_ref, x_ref, o_ref):
    # a_ref / b_ref: (1, 1) scalars in SMEM; x_ref / o_ref: VMEM tiles.
    a = a_ref[0, 0]
    b = b_ref[0, 0]
    o_ref[...] = (a * x_ref[...].astype(jnp.float32) + b).astype(o_ref.dtype)


def _round_up(v, m):
    return ((v + m - 1) // m) * m


def _normalize_layout(x):
    """Reshape (view only, no copy) into a lane/sublane-dense 2-D slab."""
    total = int(x.size)
    if x.ndim >= 2 and x.shape[-1] >= 128 and x.shape[-1] % 128 == 0:
        # Already lane-dense: keep the natural last dim.
        return x.reshape(-1, x.shape[-1])
    flat = x.reshape(-1)
    candidates = (4096, 2048, 1024, 512, 256, 128)
    # Prefer the widest lane count that still gives >= 8 sublane rows.
    for c in candidates:
        if total % c == 0 and total // c >= 8:
            return flat.reshape(total // c, c)
    for c in candidates:
        if total % c == 0:
            return flat.reshape(total // c, c)
    # Tiny / awkward totals: single full-extent row block (still legal).
    return flat.reshape(1, total)


def _choose_row_tile(M, N, itemsize, pack):
    """Pick tm (rows per tile) for the lane-dense (tm, N) tiling."""
    row_bytes = max(N * itemsize, 1)
    tm = max(pack, (_TARGET_TILE_BYTES // row_bytes) // pack * pack)
    if tm >= M:
        tm = M  # full row extent -> legal for any M / dtype
    g = pl.cdiv(M, tm)
    # v7x has 2 TensorCores; prefer an even block count >= 2 when rows allow.
    if g == 1 and M >= 2 * pack:
        tm = _round_up(pl.cdiv(M, 2), pack)
    elif g > 1 and g % 2 == 1:
        tm_even = _round_up(pl.cdiv(M, g + 1), pack)
        if tm_even >= pack:
            tm = tm_even
    return tm


def basic_example_forward(x, a, b):
    """Computes a * x + b elementwise (forward of basic_example_model)."""
    a2 = jnp.asarray(a, jnp.float32).reshape(1, 1)
    b2 = jnp.asarray(b, jnp.float32).reshape(1, 1)

    orig_shape = x.shape
    out_dtype = jnp.result_type(x.dtype, jnp.float32)  # torch-style promotion

    x2 = _normalize_layout(x)
    M, N = x2.shape
    in_itemsize = jnp.dtype(x2.dtype).itemsize
    out_itemsize = jnp.dtype(out_dtype).itemsize
    budget_itemsize = max(in_itemsize, out_itemsize)
    # Packed-sublane multiple: f32 -> 8, bf16 -> 16, int8/fp8 -> 32.
    pack = max(8, 32 // max(in_itemsize, 1))

    cost = pl.CostEstimate(
        flops=2 * M * N,
        transcendentals=0,
        bytes_accessed=M * N * (in_itemsize + out_itemsize),
    )

    if N * budget_itemsize * pack <= _TARGET_TILE_BYTES:
        # Common case: full lane extent per tile, 1-D grid over rows.
        tm = _choose_row_tile(M, N, budget_itemsize, pack)
        grid = (pl.cdiv(M, tm),)
        x_spec = pl.BlockSpec((tm, N), lambda i: (i, 0))
        o_spec = pl.BlockSpec((tm, N), lambda i: (i, 0))
        dims = ("parallel",)
    else:
        # Extremely wide rows: tile the lane dimension too (128 multiples).
        tm = M if M < pack else pack
        tn = max(128, (_TARGET_TILE_BYTES // (max(tm, 1) * budget_itemsize))
                 // 128 * 128)
        if tn >= N:
            tn = N
        grid = (pl.cdiv(M, tm), pl.cdiv(N, tn))
        x_spec = pl.BlockSpec((tm, tn), lambda i, j: (i, j))
        o_spec = pl.BlockSpec((tm, tn), lambda i, j: (i, j))
        dims = ("parallel", "parallel")

    y2 = pl.pallas_call(
        _affine_kernel,
        out_shape=jax.ShapeDtypeStruct((M, N), out_dtype),
        grid=grid,
        in_specs=[
            pl.BlockSpec(memory_space=pltpu.SMEM),  # a (scalar)
            pl.BlockSpec(memory_space=pltpu.SMEM),  # b (scalar)
            x_spec,                                 # x tile
        ],
        out_specs=o_spec,
        compiler_params=pltpu.CompilerParams(
            dimension_semantics=dims,
            vmem_limit_bytes=32 * 1024 * 1024,
        ),
        cost_estimate=cost,
    )(a2, b2, x2)
    return y2.reshape(orig_shape)


if __name__ == "__main__":
    key = jax.random.PRNGKey(0)
    ka, kb, kx1, kx2 = jax.random.split(key, 4)

    # Deterministic "parameters" (torch.randn(()) equivalents).
    a = jax.random.normal(ka, (), dtype=jnp.float32)
    b = jax.random.normal(kb, (), dtype=jnp.float32)

    # 4-D input with a narrow last dim: exercises the layout-normalization
    # path ((2,4,16,16) -> lane/sublane-dense (8, 256) slab, single block).
    x1 = jax.random.normal(kx1, (2, 4, 16, 16), dtype=jnp.float32)
    y1 = basic_example_forward(x1, a, b)
    jax.block_until_ready(y1)
    assert y1.shape == x1.shape
    assert jnp.allclose(y1, a * x1 + b, atol=1e-6, rtol=1e-6), \
        "4-D normalized-layout mismatch vs reference"

    # 2-D lane-dense input: exercises the natural-layout path with a 2-block
    # grid (megacore-splittable on v7x).
    x2 = jax.random.normal(kx2, (64, 256), dtype=jnp.float32)
    y2 = basic_example_forward(x2, a, b)
    jax.block_until_ready(y2)
    assert jnp.allclose(y2, a * x2 + b, atol=1e-6, rtol=1e-6), \
        "2-D lane-dense mismatch vs reference"

    print("KERNEL_OK")
</pallas_src>

<mosaic_0001>
module attributes {stable_mosaic.version = 11 : i64} {
  func.func @_affine_kernel(%arg0: i32, %arg1: memref<1x1xf32, #tpu.memory_space<smem>>, %arg2: memref<1x1xf32, #tpu.memory_space<smem>>, %arg3: memref<8x256xf32, #tpu.memory_space<vmem>>, %arg4: memref<8x256xf32, #tpu.memory_space<vmem>>) attributes {dimension_semantics = [#tpu.dimension_semantics<parallel>], iteration_bounds = array<i64: 1>, scalar_prefetch = 0 : i64, scratch_operands = 0 : i64, tpu.core_type = #tpu.core_type<tc>, window_params = [{transform_indices = @transform_0, window_bounds = array<i64: 1, 1>}, {transform_indices = @transform_1, window_bounds = array<i64: 1, 1>}, {transform_indices = @transform_2, window_bounds = array<i64: 8, 256>}, {transform_indices = @transform_3, window_bounds = array<i64: 8, 256>}]} {
    %c0 = arith.constant 0 : index
    %c0_0 = arith.constant 0 : index
    %0 = memref.load %arg1[%c0, %c0_0] : memref<1x1xf32, #tpu.memory_space<smem>>
    %c0_1 = arith.constant 0 : index
    %c0_2 = arith.constant 0 : index
    %1 = memref.load %arg2[%c0_1, %c0_2] : memref<1x1xf32, #tpu.memory_space<smem>>
    %c0_3 = arith.constant 0 : index
    %c0_4 = arith.constant 0 : index
    %2 = vector.load %arg3[%c0_3, %c0_4] : memref<8x256xf32, #tpu.memory_space<vmem>>, vector<8x256xf32>
    %3 = vector.broadcast %0 : f32 to vector<8x256xf32>
    %4 = arith.mulf %3, %2 : vector<8x256xf32>
    %5 = vector.broadcast %1 : f32 to vector<8x256xf32>
    %6 = arith.addf %4, %5 : vector<8x256xf32>
    %c0_5 = arith.constant 0 : index
    %c0_6 = arith.constant 0 : index
    %7 = vector.load %arg4[%c0_5, %c0_6] : memref<8x256xf32, #tpu.memory_space<vmem>>, vector<8x256xf32>
    tpu.vector_store %arg4[%c0_5, %c0_6], %6 {strides = array<i32>} : memref<8x256xf32, #tpu.memory_space<vmem>>, vector<8x256xf32>,
    return
  }
  func.func @transform_0(%arg0: i32) -> (i32, i32) {
    %c0_i32 = arith.constant 0 : i32
    %c0_i32_0 = arith.constant 0 : i32
    %c0_i32_1 = arith.constant 0 : i32
    return %c0_i32, %c0_i32_0 : i32, i32
  }
  func.func @transform_1(%arg0: i32) -> (i32, i32) {
    %c0_i32 = arith.constant 0 : i32
    %c0_i32_0 = arith.constant 0 : i32
    %c0_i32_1 = arith.constant 0 : i32
    return %c0_i32, %c0_i32_0 : i32, i32
  }
  func.func @transform_2(%arg0: i32) -> (i32, i32) {
    %c0_i32 = arith.constant 0 : i32
    %c0_i32_0 = arith.constant 0 : i32
    return %arg0, %c0_i32 : i32, i32
  }
  func.func @transform_3(%arg0: i32) -> (i32, i32) {
    %c0_i32 = arith.constant 0 : i32
    %c0_i32_0 = arith.constant 0 : i32
    return %arg0, %c0_i32 : i32, i32
  }
}

</mosaic_0001>

<bundles_post_ra>
// kernel: tpu_custom_call.1
= control target key start
LH: loop header
LB: loop body
LE: loop exit
PB: predicated region body
PF: predicated region fallthrough
CT: control target
= control target key end

     0   :  { %10 = vsyncpa [#allocation5], 0  ;;  %s158_s0 = inlined_call_operand.<no memory space> [shape: f32[1,1], index: 0, kind: input, shape index: {}]   ;;  %s159_s1 = inlined_call_operand.<no memory space> [shape: f32[1,1], index: 1, kind: input, shape index: {}]   ;;  %s160_s2 = inlined_call_operand.hbm [shape: f32[8,256], index: 2, kind: input, shape index: {}]   ;;  %s161_s3 = inlined_call_operand.hbm [shape: f32[8,256], index: 3, kind: output, shape index: {}]  }
   0x1   :  { %11 = vsyncpa [#allocation6], 0  ;;  %s106_s12 = smov [#allocation4]   ;;  %s58_s16 = scalar_lea.hbm %s160_s2, 256 }
   0x2   :  { %s22_s13 = sshll.u32 %s106_s12, 4  ;;  %p59_p0 = scmp.ne.s32.totalorder %s160_s2, %s58_s16  ;;  %s23_s13 = int_to_ptr.vmem [resolvable:$true] %s22_s13 }
   0x3   :  { %p62_p1 = scmp.lt.u32.totalorder %s58_s16, %s160_s2 }
   0x5   :  { %p64_p2 = pnand %p62_p1, %p59_p0 }
   0x7   :  { %67 = shalt.err (!%p64_p2)
}
   0x8   :  { %s68_s21 = scalar_lea.vmem %s23_s13, 256  ;;  %p73_p4 = scmp.lt.s32.totalorder %s23_s13, %s23_s13 }
   0x9   :  { %p69_p3 = scmp.ne.s32.totalorder %s23_s13, %s68_s21  ;;  %p74_p5 = scmp.lt.s32.totalorder %s68_s21, %s68_s21 }
   0xb   :  { %p75_p6 = por %p74_p5, %p73_p4 }
   0xd   :  { %p76_p7 = pnand %p75_p6, %p69_p3 }
   0xf   :  { %79 = shalt.err (!%p76_p7)
}
  0x10   :  { %25 = dma.hbm_to_vmem [thread:$0]  %s160_s2, 256, %s23_s13, [#allocation5]  }
  0x11   :  { %102 = dma.done.wait [#allocation5], 256  }
  0x12   :  { %103 = vsyncadd [#allocation5], 4294967040  ;;  %v33_v0 = vstv %s158_s0  ;;  %v31_v1 = vld [vmem:[#allocation4] sm:$0xff]  ;;  %v36_v2 = vstv %s159_s1  ;;  %v32_v3 = vld [vmem:[#allocation4 + $0x8] sm:$0xff]  ;;  %s107_s28 = smov [#allocation7]  }
  0x13   :  { %s47_s29 = sshll.u32 %s107_s28, 4  ;;  %v34_v4 = vmul.f32 %v33_v0, %v31_v1  ;;  %v35_v5 = vmul.f32 %v33_v0, %v32_v3  ;;  %s48_s29 = int_to_ptr.vmem [resolvable:$true] %s47_s29 }
  0x14   :  { %s80_s2 = scalar_lea.vmem %s48_s29, 256  ;;  %p85_p9 = scmp.lt.s32.totalorder %s48_s29, %s48_s29 }
  0x15   :  { %v37_v6 = vadd.f32 %v36_v2, %v34_v4  ;;  %v38_v7 = vadd.f32 %v36_v2, %v35_v5  ;;  %p81_p8 = scmp.ne.s32.totalorder %s48_s29, %s80_s2  ;;  %p86_p10 = scmp.lt.s32.totalorder %s80_s2, %s80_s2 }
  0x17   :  { %39 = vst [vmem:[#allocation7] sm:$0xff] %v37_v6  ;;  %40 = vst [vmem:[#allocation7 + $0x8] sm:$0xff] %v38_v7  ;;  %p87_p11 = por %p86_p10, %p85_p9 }
  0x19   :  { %p88_p12 = pnand %p87_p11, %p81_p8 }
  0x1b   :  { %91 = shalt.err (!%p88_p12)
}
  0x1c   :  { %s92_s1 = scalar_lea.hbm %s161_s3, 256 }
  0x1d   :  { %p93_p13 = scmp.ne.s32.totalorder %s161_s3, %s92_s1  ;;  %p96_p0 = scmp.lt.u32.totalorder %s92_s1, %s161_s3 }
  0x1f   :  { %p98_p1 = pnand %p96_p0, %p93_p13 }
  0x21   :  { %101 = shalt.err (!%p98_p1)
}
  0x22   :  { %50 = dma.vmem_to_hbm [thread:$0]  %s48_s29, 256, %s161_s3, [#allocation6]  }
  0x23   :  { %104 = dma.done.wait [#allocation6], 256  }
  0x24   :  { %105 = vsyncadd [#allocation6], 4294967040 }
  0x25   :  { %54 = vsyncpa [#allocation5], 1 }
  0x26   :  { %55 = vsyncpa [#allocation6], 1 }

</bundles_post_ra>
